<compile_context>
chip_gen: v7x
topology: tpu7x:2x2x1
jax: 0.10.0
libtpu: 0.0.40
codegen_flags: <defaults>
</compile_context>

<pallas_src>
import functools

import jax
import jax.numpy as jnp
from jax.experimental import pallas as pl
from jax.experimental.pallas import tpu as pltpu


def _round_up(x, m):
    return (x + m - 1) // m * m


def _pick_tile(dim, pref, granule):
    """Largest divisor of `dim` that is a multiple of `granule` and <= pref.

    `dim` is either <= pref (full-dim block, always legal) or has been padded
    to a multiple of `granule`, so the search always succeeds."""
    if dim <= pref:
        return dim
    t = (pref // granule) * granule
    while t >= granule:
        if dim % t == 0:
            return t
        t -= granule
    return dim  # unreachable once dim % granule == 0; kept as a safety net


# ---------------------------------------------------------------------------
# Packed (small-layer) path: one gridless kernel, static unroll over E.
# ---------------------------------------------------------------------------
def _packed_kernel(x_ref, w_ref, b_ref, o_ref, *, ensemble_size):
    # x_ref: (E, B, I)  w_ref: (E, I, O)  b_ref: (E, O)  o_ref: (E, B, O)
    outs = []
    for e in range(ensemble_size):  # E is small -> static unroll.
        acc = jnp.dot(x_ref[e], w_ref[e], preferred_element_type=jnp.float32)
        acc = acc + b_ref[pl.ds(e, 1), :].astype(jnp.float32)  # (1, O) bcast
        outs.append(acc)
    o_ref[...] = jnp.stack(outs, axis=0).astype(o_ref.dtype)


def _ensemble_fc_packed(x, weight, bias, out_dtype):
    E, B, I = x.shape
    O = weight.shape[-1]

    cost = pl.CostEstimate(
        flops=2 * E * B * I * O,  # real FLOPs (no block-diag zeros anymore)
        transcendentals=0,
        bytes_accessed=int(
            x.size * jnp.dtype(x.dtype).itemsize
            + weight.size * jnp.dtype(weight.dtype).itemsize
            + bias.size * jnp.dtype(bias.dtype).itemsize
            + E * B * O * jnp.dtype(out_dtype).itemsize
        ),
    )

    # Gridless => pinned to one TensorCore.  Intentional: this path is gated
    # to tiny, latency-bound layers where per-grid-step overhead (and wrapper
    # op launches) would dominate.  Large layers take the tiled path below.
    return pl.pallas_call(
        functools.partial(_packed_kernel, ensemble_size=E),
        out_shape=jax.ShapeDtypeStruct((E, B, O), out_dtype),
        in_specs=[
            pl.BlockSpec(memory_space=pltpu.MemorySpace.VMEM),
            pl.BlockSpec(memory_space=pltpu.MemorySpace.VMEM),
            pl.BlockSpec(memory_space=pltpu.MemorySpace.VMEM),
        ],
        out_specs=pl.BlockSpec(memory_space=pltpu.MemorySpace.VMEM),
        cost_estimate=cost,
    )(x, weight, bias)


# ---------------------------------------------------------------------------
# Tiled (large-layer) path: grid = (E, B/tb, O/tn, I/tk), reduction axis last.
# ---------------------------------------------------------------------------
def _tiled_kernel_inplace(x_ref, w_ref, b_ref, o_ref):
    # f32 output: the resident output block IS the accumulator (no scratch,
    # no epilogue copy).
    k = pl.program_id(3)

    @pl.when(k == 0)
    def _():
        o_ref[...] = jnp.broadcast_to(b_ref[...].astype(jnp.float32),
                                      o_ref.shape)

    o_ref[...] += jnp.dot(x_ref[...], w_ref[...],
                          preferred_element_type=jnp.float32)


def _tiled_kernel_scratch(x_ref, w_ref, b_ref, o_ref, acc_ref):
    # Narrow (non-f32) output: accumulate in an f32 scratch, cast at the end.
    k = pl.program_id(3)

    @pl.when(k == 0)
    def _():
        acc_ref[...] = jnp.zeros_like(acc_ref)

    acc_ref[...] += jnp.dot(x_ref[...], w_ref[...],
                            preferred_element_type=jnp.float32)

    @pl.when(k == pl.num_programs(3) - 1)
    def _():
        o_ref[...] = (acc_ref[...]
                      + b_ref[...].astype(jnp.float32)).astype(o_ref.dtype)


def _ensemble_fc_tiled(x, weight, bias, out_dtype):
    E, B, I = x.shape
    O = weight.shape[-1]

    itemsize = jnp.dtype(x.dtype).itemsize
    sub = 8 * max(1, 4 // itemsize)      # sublane pack: f32->8, bf16->16, i8->32
    tb_pref = 1024 if B >= 2048 else 512
    tn_pref = 1024
    tk_pref = 512

    # Ragged large dims: zero-pad to the tiling granule (exact for the K
    # contraction; padded output rows/cols are sliced off afterwards).
    B_p = B if B <= tb_pref else _round_up(B, sub)
    I_p = I if I <= tk_pref else _round_up(I, 128)
    O_p = O if O <= tn_pref else _round_up(O, 128)
    if (B_p, I_p) != (B, I):
        x = jnp.pad(x, ((0, 0), (0, B_p - B), (0, I_p - I)))
    if (I_p, O_p) != (I, O):
        weight = jnp.pad(weight, ((0, 0), (0, I_p - I), (0, O_p - O)))
    if O_p != O:
        bias = jnp.pad(bias, ((0, 0), (0, O_p - O)))

    tb = _pick_tile(B_p, tb_pref, sub)
    tn = _pick_tile(O_p, tn_pref, 128)
    tk = _pick_tile(I_p, tk_pref, 128)
    grid = (E, B_p // tb, O_p // tn, I_p // tk)

    inplace = jnp.dtype(out_dtype) == jnp.dtype(jnp.float32)
    out_item = jnp.dtype(out_dtype).itemsize
    b_item = jnp.dtype(bias.dtype).itemsize

    # Double-buffered per-step footprint; raise the scoped-VMEM limit to fit
    # (v5e default 16 MiB, v6e/v7x 32 MiB).  Cap at 64 MiB (v7x physical).
    blk_bytes = (2 * (tb * tk * itemsize + tk * tn * itemsize + tn * b_item)
                 + 2 * tb * tn * out_item
                 + (0 if inplace else tb * tn * 4))
    vmem_limit = int(min(max(32 << 20, (blk_bytes * 3) // 2), 64 << 20))

    # Honest HBM-traffic estimate: x is re-read O_p/tn times, weight B_p/tb.
    cost = pl.CostEstimate(
        flops=2 * E * B_p * I_p * O_p,
        transcendentals=0,
        bytes_accessed=int(
            E * B_p * I_p * itemsize * (O_p // tn)
            + E * I_p * O_p * itemsize * (B_p // tb)
            + E * O_p * b_item
            + E * B_p * O_p * out_item
        ),
    )

    kernel = _tiled_kernel_inplace if inplace else _tiled_kernel_scratch
    scratch = [] if inplace else [pltpu.VMEM((tb, tn), jnp.float32)]

    out = pl.pallas_call(
        kernel,
        out_shape=jax.ShapeDtypeStruct((E, B_p, O_p), out_dtype),
        grid_spec=pltpu.PrefetchScalarGridSpec(
            num_scalar_prefetch=0,
            grid=grid,
            in_specs=[
                pl.BlockSpec((pl.Squeezed(), tb, tk), lambda e, b, n, k: (e, b, k)),
                # TODO(synk): if per-step DMA is still exposed after the tile
                # bump, sweep pipeline_mode=pl.Buffered(3) on this weight spec.
                pl.BlockSpec((pl.Squeezed(), tk, tn), lambda e, b, n, k: (e, k, n)),
                pl.BlockSpec((1, tn), lambda e, b, n, k: (e, n)),
            ],
            out_specs=pl.BlockSpec(
                (pl.Squeezed(), tb, tn), lambda e, b, n, k: (e, b, n)
            ),
            scratch_shapes=scratch,
        ),
        compiler_params=pltpu.CompilerParams(
            dimension_semantics=("parallel", "parallel", "parallel", "arbitrary"),
            vmem_limit_bytes=vmem_limit,
        ),
        cost_estimate=cost,
    )(x, weight, bias)

    if (B_p, O_p) != (B, O):
        out = out[:, :B, :O]
    return out


# ---------------------------------------------------------------------------
# Public wrapper.
# ---------------------------------------------------------------------------
def ensemble_fc(x, weight, bias, *, matmul_dtype=None, path="auto"):
    """EnsembleFC forward: bmm(x, weight) + bias[:, None, :].

    x: (E, B, I), weight: (E, I, O), bias: (E, O) -> (E, B, O).
    matmul_dtype: optional MXU-input dtype (e.g. jnp.bfloat16); the cast is
    applied in the wrapper so HBM bytes shrink, accumulation stays f32.
    path: "auto" | "packed" | "tiled".
    """
    E, B, I = x.shape
    O = weight.shape[-1]
    assert weight.shape == (E, I, O)
    assert bias.shape == (E, O)

    out_dtype = x.dtype

    if matmul_dtype is not None and jnp.dtype(matmul_dtype) != jnp.dtype(x.dtype):
        x = x.astype(matmul_dtype)
        weight = weight.astype(matmul_dtype)

    itemsize = jnp.dtype(x.dtype).itemsize
    total_bytes = ((x.size + weight.size) * itemsize
                   + bias.size * jnp.dtype(bias.dtype).itemsize
                   + E * B * O * jnp.dtype(out_dtype).itemsize)
    small = total_bytes <= (4 << 20) and E <= 16

    if path == "packed" or (path == "auto" and small):
        return _ensemble_fc_packed(x, weight, bias, out_dtype)
    return _ensemble_fc_tiled(x, weight, bias, out_dtype)


if __name__ == "__main__":
    # Small shapes consistent with the module: ensemble of 4 members,
    # batch 8, in_features 32, out_features 32.
    E, B, I, O = 4, 8, 32, 32

    key = jax.random.PRNGKey(0)
    kx, kw, kb = jax.random.split(key, 3)

    x = jax.random.normal(kx, (E, B, I), dtype=jnp.float32)
    # reset_parameters() is a no-op in the reference module; fixed random init.
    weight = jax.random.normal(kw, (E, I, O), dtype=jnp.float32) * 0.1
    bias = jax.random.normal(kb, (E, O), dtype=jnp.float32) * 0.1

    ref = (jnp.einsum("ebi,eio->ebo", x, weight,
                      precision=jax.lax.Precision.HIGHEST)
           + bias[:, None, :])

    # Packed (gridless, E-unrolled) path — selected automatically here.
    out = jax.block_until_ready(ensemble_fc(x, weight, bias))
    assert out.shape == (E, B, O)
    assert jnp.allclose(out, ref, atol=1e-4, rtol=1e-4)

    # Tiled path at the same small shapes (coverage).
    out_tiled = jax.block_until_ready(ensemble_fc(x, weight, bias, path="tiled"))
    assert jnp.allclose(out_tiled, ref, atol=1e-4, rtol=1e-4)

    # bf16 MXU inputs (wrapper-side cast), f32 accumulation — looser tolerance.
    out_bf16 = jax.block_until_ready(
        ensemble_fc(x, weight, bias, matmul_dtype=jnp.bfloat16))
    assert jnp.allclose(out_bf16, ref, atol=5e-2, rtol=5e-2)

    # Slightly larger tiled case exercising the K-accumulation loop (k grid > 1).
    E2, B2, I2, O2 = 2, 64, 640, 256
    k2 = jax.random.split(jax.random.PRNGKey(0), 3)
    x2 = jax.random.normal(k2[0], (E2, B2, I2), dtype=jnp.float32)
    w2 = jax.random.normal(k2[1], (E2, I2, O2), dtype=jnp.float32) * 0.05
    b2 = jax.random.normal(k2[2], (E2, O2), dtype=jnp.float32) * 0.05
    ref2 = (jnp.einsum("ebi,eio->ebo", x2, w2,
                       precision=jax.lax.Precision.HIGHEST)
            + b2[:, None, :])
    out2 = jax.block_until_ready(ensemble_fc(x2, w2, b2, path="tiled"))
    assert out2.shape == (E2, B2, O2)
    assert jnp.allclose(out2, ref2, atol=1e-3, rtol=1e-3)

    print("KERNEL_OK")
</pallas_src>

<mosaic_0001>
module attributes {stable_mosaic.version = 11 : i64} {
  func.func @_packed_kernel(%arg0: memref<4x8x32xf32, #tpu.memory_space<vmem>>, %arg1: memref<4x32x32xf32, #tpu.memory_space<vmem>>, %arg2: memref<4x32xf32, #tpu.memory_space<vmem>>, %arg3: memref<4x8x32xf32, #tpu.memory_space<vmem>>) attributes {dimension_semantics = [], scalar_prefetch = 0 : i64, scratch_operands = 0 : i64, tpu.core_type = #tpu.core_type<tc>} {
    %c0 = arith.constant 0 : index
    %c0_0 = arith.constant 0 : index
    %c0_1 = arith.constant 0 : index
    %0 = vector.load %arg0[%c0, %c0_0, %c0_1] : memref<4x8x32xf32, #tpu.memory_space<vmem>>, vector<1x8x32xf32>
    %1 = vector.shape_cast %0 : vector<1x8x32xf32> to vector<8x32xf32>
    %c0_2 = arith.constant 0 : index
    %c0_3 = arith.constant 0 : index
    %c0_4 = arith.constant 0 : index
    %2 = vector.load %arg1[%c0_2, %c0_3, %c0_4] : memref<4x32x32xf32, #tpu.memory_space<vmem>>, vector<1x32x32xf32>
    %3 = vector.shape_cast %2 : vector<1x32x32xf32> to vector<32x32xf32>
    %cst = arith.constant dense<0.000000e+00> : vector<8x32xf32>
    %4 = tpu.matmul %1, %3, %cst {dimension_numbers = #tpu.dot_dimension_numbers<[1], [0], [0], [1], [0, 0, 1, 1], [], []>} : vector<8x32xf32>, vector<32x32xf32>, vector<8x32xf32> -> vector<8x32xf32>
    %c0_5 = arith.constant 0 : index
    %c0_6 = arith.constant 0 : index
    %5 = vector.load %arg2[%c0_5, %c0_6] : memref<4x32xf32, #tpu.memory_space<vmem>>, vector<1x32xf32>
    %6 = vector.broadcast %5 : vector<1x32xf32> to vector<8x32xf32>
    %7 = arith.addf %4, %6 : vector<8x32xf32>
    %c1 = arith.constant 1 : index
    %c0_7 = arith.constant 0 : index
    %c0_8 = arith.constant 0 : index
    %8 = vector.load %arg0[%c1, %c0_7, %c0_8] : memref<4x8x32xf32, #tpu.memory_space<vmem>>, vector<1x8x32xf32>
    %9 = vector.shape_cast %8 : vector<1x8x32xf32> to vector<8x32xf32>
    %c1_9 = arith.constant 1 : index
    %c0_10 = arith.constant 0 : index
    %c0_11 = arith.constant 0 : index
    %10 = vector.load %arg1[%c1_9, %c0_10, %c0_11] : memref<4x32x32xf32, #tpu.memory_space<vmem>>, vector<1x32x32xf32>
    %11 = vector.shape_cast %10 : vector<1x32x32xf32> to vector<32x32xf32>
    %cst_12 = arith.constant dense<0.000000e+00> : vector<8x32xf32>
    %12 = tpu.matmul %9, %11, %cst_12 {dimension_numbers = #tpu.dot_dimension_numbers<[1], [0], [0], [1], [0, 0, 1, 1], [], []>} : vector<8x32xf32>, vector<32x32xf32>, vector<8x32xf32> -> vector<8x32xf32>
    %c1_13 = arith.constant 1 : index
    %c0_14 = arith.constant 0 : index
    %13 = vector.load %arg2[%c1_13, %c0_14] : memref<4x32xf32, #tpu.memory_space<vmem>>, vector<1x32xf32>
    %14 = vector.broadcast %13 : vector<1x32xf32> to vector<8x32xf32>
    %15 = arith.addf %12, %14 : vector<8x32xf32>
    %c2 = arith.constant 2 : index
    %c0_15 = arith.constant 0 : index
    %c0_16 = arith.constant 0 : index
    %16 = vector.load %arg0[%c2, %c0_15, %c0_16] : memref<4x8x32xf32, #tpu.memory_space<vmem>>, vector<1x8x32xf32>
    %17 = vector.shape_cast %16 : vector<1x8x32xf32> to vector<8x32xf32>
    %c2_17 = arith.constant 2 : index
    %c0_18 = arith.constant 0 : index
    %c0_19 = arith.constant 0 : index
    %18 = vector.load %arg1[%c2_17, %c0_18, %c0_19] : memref<4x32x32xf32, #tpu.memory_space<vmem>>, vector<1x32x32xf32>
    %19 = vector.shape_cast %18 : vector<1x32x32xf32> to vector<32x32xf32>
    %cst_20 = arith.constant dense<0.000000e+00> : vector<8x32xf32>
    %20 = tpu.matmul %17, %19, %cst_20 {dimension_numbers = #tpu.dot_dimension_numbers<[1], [0], [0], [1], [0, 0, 1, 1], [], []>} : vector<8x32xf32>, vector<32x32xf32>, vector<8x32xf32> -> vector<8x32xf32>
    %c2_21 = arith.constant 2 : index
    %c0_22 = arith.constant 0 : index
    %21 = vector.load %arg2[%c2_21, %c0_22] : memref<4x32xf32, #tpu.memory_space<vmem>>, vector<1x32xf32>
    %22 = vector.broadcast %21 : vector<1x32xf32> to vector<8x32xf32>
    %23 = arith.addf %20, %22 : vector<8x32xf32>
    %c3 = arith.constant 3 : index
    %c0_23 = arith.constant 0 : index
    %c0_24 = arith.constant 0 : index
    %24 = vector.load %arg0[%c3, %c0_23, %c0_24] : memref<4x8x32xf32, #tpu.memory_space<vmem>>, vector<1x8x32xf32>
    %25 = vector.shape_cast %24 : vector<1x8x32xf32> to vector<8x32xf32>
    %c3_25 = arith.constant 3 : index
    %c0_26 = arith.constant 0 : index
    %c0_27 = arith.constant 0 : index
    %26 = vector.load %arg1[%c3_25, %c0_26, %c0_27] : memref<4x32x32xf32, #tpu.memory_space<vmem>>, vector<1x32x32xf32>
    %27 = vector.shape_cast %26 : vector<1x32x32xf32> to vector<32x32xf32>
    %cst_28 = arith.constant dense<0.000000e+00> : vector<8x32xf32>
    %28 = tpu.matmul %25, %27, %cst_28 {dimension_numbers = #tpu.dot_dimension_numbers<[1], [0], [0], [1], [0, 0, 1, 1], [], []>} : vector<8x32xf32>, vector<32x32xf32>, vector<8x32xf32> -> vector<8x32xf32>
    %c3_29 = arith.constant 3 : index
    %c0_30 = arith.constant 0 : index
    %29 = vector.load %arg2[%c3_29, %c0_30] : memref<4x32xf32, #tpu.memory_space<vmem>>, vector<1x32xf32>
    %30 = vector.broadcast %29 : vector<1x32xf32> to vector<8x32xf32>
    %31 = arith.addf %28, %30 : vector<8x32xf32>
    %32 = vector.shape_cast %7 : vector<8x32xf32> to vector<1x8x32xf32>
    %33 = vector.shape_cast %15 : vector<8x32xf32> to vector<1x8x32xf32>
    %34 = vector.shape_cast %23 : vector<8x32xf32> to vector<1x8x32xf32>
    %35 = vector.shape_cast %31 : vector<8x32xf32> to vector<1x8x32xf32>
    %36 = tpu.concatenate %32, %33, %34, %35 in 0 : vector<1x8x32xf32>, vector<1x8x32xf32>, vector<1x8x32xf32>, vector<1x8x32xf32> -> vector<4x8x32xf32>
    %c0_31 = arith.constant 0 : index
    %c0_32 = arith.constant 0 : index
    %c0_33 = arith.constant 0 : index
    %37 = vector.load %arg3[%c0_31, %c0_32, %c0_33] : memref<4x8x32xf32, #tpu.memory_space<vmem>>, vector<4x8x32xf32>
    tpu.vector_store %arg3[%c0_31, %c0_32, %c0_33], %36 {strides = array<i32>} : memref<4x8x32xf32, #tpu.memory_space<vmem>>, vector<4x8x32xf32>,
    return
  }
}

</mosaic_0001>

<bundles_post_ra>
// kernel: tpu_custom_call.1
= control target key start
LH: loop header
LB: loop body
LE: loop exit
PB: predicated region body
PF: predicated region fallthrough
CT: control target
= control target key end

     0   :  { %8 = vsyncpa [#allocation3], 0  ;;  %s677_s0 = inlined_call_operand.hbm [shape: f32[4,8,32], index: 0, kind: input, shape index: {}]   ;;  %s678_s1 = inlined_call_operand.hbm [shape: f32[4,32,32], index: 1, kind: input, shape index: {}]   ;;  %s679_s2 = inlined_call_operand.vmem [shape: f32[4,32], index: 2, kind: input, shape index: {}]   ;;  %s680_s3 = inlined_call_operand.hbm [shape: f32[4,8,32], index: 3, kind: output, shape index: {}]  }
   0x1   :  { %9 = vsyncpa [#allocation6], 0 }
   0x2   :  { %10 = vsyncpa [#allocation4], 0  ;;  %s580_s12 = smov [#allocation2]   ;;  %s508_s16 = scalar_lea.hbm %s677_s0, 512 }
   0x3   :  { %s16_s13 = sshll.u32 %s580_s12, 4  ;;  %p509_p0 = scmp.ne.s32.totalorder %s677_s0, %s508_s16  ;;  %s17_s13 = int_to_ptr.vmem [resolvable:$true] %s16_s13 }
   0x4   :  { %p512_p1 = scmp.lt.u32.totalorder %s508_s16, %s677_s0 }
   0x6   :  { %p514_p2 = pnand %p512_p1, %p509_p0 }
   0x8   :  { %517 = shalt.err (!%p514_p2)
}
   0x9   :  { %s518_s21 = scalar_lea.vmem %s17_s13, 512  ;;  %p523_p4 = scmp.lt.s32.totalorder %s17_s13, %s17_s13 }
   0xa   :  { %p519_p3 = scmp.ne.s32.totalorder %s17_s13, %s518_s21  ;;  %p524_p5 = scmp.lt.s32.totalorder %s518_s21, %s518_s21 }
   0xc   :  { %p525_p6 = por %p524_p5, %p523_p4 }
   0xe   :  { %p526_p7 = pnand %p525_p6, %p519_p3 }
  0x10   :  { %529 = shalt.err (!%p526_p7)
}
  0x11   :  { %s581_s22 = smov 128   ;;  %s582_s23 = smov 8  }
  0x12   :  { %22 = dma.hbm_to_vmem [thread:$0]  %s677_s0, 512, %s17_s13, [#allocation3], %s581_s22, %s581_s22, %s582_s23  }
  0x13   :  { %s583_s26 = smov [#allocation5]   ;;  %s530_s30 = scalar_lea.hbm %s678_s1, 2048 }
  0x14   :  { %s28_s27 = sshll.u32 %s583_s26, 4  ;;  %p531_p8 = scmp.ne.s32.totalorder %s678_s1, %s530_s30  ;;  %s29_s27 = int_to_ptr.vmem [resolvable:$true] %s28_s27 }
  0x15   :  { %p534_p9 = scmp.lt.u32.totalorder %s530_s30, %s678_s1 }
  0x17   :  { %p536_p10 = pnand %p534_p9, %p531_p8 }
  0x19   :  { %539 = shalt.err (!%p536_p10)
}
  0x1a   :  { %s540_s8 = scalar_lea.vmem %s29_s27, 2048  ;;  %p545_p12 = scmp.lt.s32.totalorder %s29_s27, %s29_s27 }
  0x1b   :  { %p541_p11 = scmp.ne.s32.totalorder %s29_s27, %s540_s8  ;;  %p546_p13 = scmp.lt.s32.totalorder %s540_s8, %s540_s8 }
  0x1d   :  { %p547_p0 = por %p546_p13, %p545_p12 }
  0x1f   :  { %p548_p1 = pnand %p547_p0, %p541_p11 }
  0x21   :  { %551 = shalt.err (!%p548_p1)
}
  0x22   :  { %34 = dma.hbm_to_vmem [thread:$0]  %s678_s1, 2048, %s29_s27, [#allocation6], %s581_s22, %s581_s22, %s582_s23  }
  0x23   :  { %574 = dma.done.wait [#allocation3], 512  }
  0x24   :  { %575 = vsyncadd [#allocation3], 4294966784 }
  0x25   :  { %576 = dma.done.wait [#allocation6], 2048  }
  0x26   :  { %577 = vsyncadd [#allocation6], 4294965248  ;;  %v584_v0 = vmov 0.0|0.0   ;;  %vm585_vm0 = vmmov 0   ;;  %v586_v1 = vmov 0.0   ;;  %v44_v2 = vld [vmem:[#allocation5] sm:$0xff] }
  0x27   :  { %476 = vmatprep.subr.bf16.mxu0 %v584_v0  ;;  %482 = vmatprep.subr.bf16.mxu1 %v584_v0  ;;  %v45_v3 = vld [vmem:[#allocation5 + $0x8] sm:$0xff]  ;;  %v130_v4 = vld [vmem:[#allocation5 + $0x20] sm:$0xff]  ;;  %v46_v7 = vld [vmem:[#allocation5 + $0x10] sm:$0xff]  ;;  %vm53_vm1 = vcmask 261120   ;;  %s587_s17 = smov [#allocation7]  }
  0x28   :  { %440 = vmatprep.mubr.msk.f32.mxu0 %vm585_vm0, %v586_v1  ;;  %451 = vmatprep.mubr.msk.f32.mxu1 %vm585_vm0, %v586_v1  ;;  %v477_v5 = vpack.c.bf16 %v45_v3, %v44_v2  ;;  %v131_v6 = vld [vmem:[#allocation5 + $0x28] sm:$0xff]  ;;  %v47_v8 = vld [vmem:[#allocation5 + $0x18] sm:$0xff]  ;;  %v132_v10 = vld [vmem:[#allocation5 + $0x30] sm:$0xff]  ;;  %s391_s18 = sshll.u32 %s587_s17, 4  ;;  %s392_s18 = int_to_ptr.vmem [resolvable:$true] %s391_s18 }
  0x29   :  { %v483_v9 = vpack.c.bf16 %v131_v6, %v130_v4  ;;  %v133_v11 = vld [vmem:[#allocation5 + $0x38] sm:$0xff]  ;;  %v480_v12 = vpack.c.bf16 %v47_v8, %v46_v7  ;;  %v215_v14 = vld [vmem:[#allocation5 + $0x40] sm:$0xff]  ;;  %v216_v15 = vld [vmem:[#allocation5 + $0x48] sm:$0xff]  ;;  %s552_s19 = scalar_lea.vmem %s392_s18, 512  ;;  %p557_p3 = scmp.lt.s32.totalorder %s392_s18, %s392_s18 }
  0x2a   :  { %478 = vmatpush3.bf16.msra.mxu0 %v477_v5  ;;  %v486_v13 = vpack.c.bf16 %v133_v11, %v132_v10  ;;  %v300_v16 = vld [vmem:[#allocation5 + $0x60] sm:$0xff]  ;;  %v301_v17 = vld [vmem:[#allocation5 + $0x68] sm:$0xff]  ;;  %v489_v19 = vpack.c.bf16 %v216_v15, %v215_v14  ;;  %v217_v22 = vld [vmem:[#allocation5 + $0x50] sm:$0xff]  ;;  %p553_p2 = scmp.ne.s32.totalorder %s392_s18, %s552_s19  ;;  %p558_p4 = scmp.lt.s32.totalorder %s552_s19, %s552_s19 }
  0x2b   :  { %484 = vmatpush3.bf16.msra.mxu1 %v483_v9  ;;  %479 = vmatprep.subr.bf16.mxu0 %v584_v0  ;;  %v43_v18 = vld [vmem:[#allocation2] sm:$0xff]  ;;  %v128_v20 = vld [vmem:[#allocation2 + $0x8] sm:$0xff]  ;;  %v495_v21 = vpack.c.bf16 %v301_v17, %v300_v16  ;;  %v218_v23 = vld [vmem:[#allocation5 + $0x58] sm:$0xff] }
  0x2c   :  { %485 = vmatprep.subr.bf16.mxu1 %v584_v0  ;;  %v302_v24 = vld [vmem:[#allocation5 + $0x70] sm:$0xff]  ;;  %v303_v25 = vld [vmem:[#allocation5 + $0x78] sm:$0xff]  ;;  %v492_v26 = vpack.c.bf16 %v218_v23, %v217_v22  ;;  %v404_v30 = vld [vmem:[%s679_s2] ss:$0 sm:$0xff]  ;;  %p559_p5 = por %p558_p4, %p557_p3 }
  0x2d   :  { %v498_v27 = vpack.c.bf16 %v303_v25, %v302_v24  ;;  %v213_v28 = vld [vmem:[#allocation2 + $0x10] sm:$0xff]  ;;  %v298_v29 = vld [vmem:[#allocation2 + $0x18] sm:$0xff]  ;;  %v406_v31 = vld [vmem:[%s679_s2 + $0x1] ss:$0 sm:$0xff] }
  0x2e   :  { %481 = vmatpush3.bf16.msra.mxu0 %v480_v12  ;;  %v408_v38 = vld [vmem:[%s679_s2 + $0x2] ss:$0 sm:$0xff]  ;;  %v410_v39 = vld [vmem:[%s679_s2 + $0x3] ss:$0 sm:$0xff]  ;;  %p560_p6 = pnand %p559_p5, %p553_p2 }
  0x2f   :  { %487 = vmatpush3.bf16.msra.mxu1 %v486_v13  ;;  %488 = vmatprep.subr.bf16.mxu0 %v584_v0 }
  0x30   :  { %494 = vmatprep.subr.bf16.mxu1 %v584_v0 }
  0x31   :  { %441 = vmatmul.mubr.msk.f32.vlgmr.msra.gmra.mrb[0].mxu0 %vm53_vm1, %v43_v18 }
  0x32   :  { %452 = vmatmul.mubr.msk.f32.vlgmr.msra.gmra.mrb[0].mxu1 %vm53_vm1, %v128_v20  ;;  %490 = vmatpush3.bf16.msra.mxu0 %v489_v19 }
  0x33   :  { %496 = vmatpush3.bf16.msra.mxu1 %v495_v21  ;;  %491 = vmatprep.subr.bf16.mxu0 %v584_v0 }
  0x34   :  { %497 = vmatprep.subr.bf16.mxu1 %v584_v0  ;;  %462 = vmatprep.mubr.msk.f32.mxu0 %vm585_vm0, %v586_v1 }
  0x35   :  { %473 = vmatprep.mubr.msk.f32.mxu1 %vm585_vm0, %v586_v1 }
  0x36   :  { %493 = vmatpush3.bf16.msra.mxu0 %v492_v26 }
  0x37   :  { %499 = vmatpush3.bf16.msra.mxu1 %v498_v27 }
  0x39   :  { %463 = vmatmul.mubr.msk.f32.vlgmr.msra.gmra.mrb[2].mxu0 %vm53_vm1, %v213_v28 }
  0x3a   :  { %474 = vmatmul.mubr.msk.f32.vlgmr.msra.gmra.mrb[2].mxu1 %vm53_vm1, %v298_v29 }
 0x104   :  { %v123_v32 = vpop.f32.mrb[0].mxu0 }
 0x105   :  { %v124_v33 = vadd.f32 %v404_v30, %v123_v32  ;;  %v208_v34 = vpop.f32.mrb[0].mxu1  ;;  %v442_v35 = vpop.f32.mrb[1].mxu0 }
 0x106   :  { %v209_v36 = vadd.f32 %v406_v31, %v208_v34  ;;  %v453_v37 = vpop.f32.mrb[1].mxu1 }
 0x107   :  { %382 = vst.msk [vmem:[#allocation7] sm:$0xff] %vm53_vm1, %v124_v33 }
 0x108   :  { %383 = vst.msk [vmem:[#allocation7 + $0x8] sm:$0xff] %vm53_vm1, %v209_v36 }
 0x10c   :  { %v293_v40 = vpop.f32.mrb[2].mxu0 }
 0x10d   :  { %v294_v41 = vadd.f32 %v408_v38, %v293_v40  ;;  %v378_v42 = vpop.f32.mrb[2].mxu1  ;;  %v464_v43 = vpop.f32.mrb[3].mxu0 }
 0x10e   :  { %v379_v44 = vadd.f32 %v410_v39, %v378_v42  ;;  %v475_v45 = vpop.f32.mrb[3].mxu1 }
 0x10f   :  { %384 = vst.msk [vmem:[#allocation7 + $0x10] sm:$0xff] %vm53_vm1, %v294_v41 }
 0x110   :  { %385 = vst.msk [vmem:[#allocation7 + $0x18] sm:$0xff] %vm53_vm1, %v379_v44 }
 0x111   :  { %563 = shalt.err (!%p560_p6)
}
 0x112   :  { %s564_s21 = scalar_lea.hbm %s680_s3, 512 }
 0x113   :  { %p565_p7 = scmp.ne.s32.totalorder %s680_s3, %s564_s21  ;;  %p568_p8 = scmp.lt.u32.totalorder %s564_s21, %s680_s3 }
 0x115   :  { %p570_p9 = pnand %p568_p8, %p565_p7 }
 0x117   :  { %573 = shalt.err (!%p570_p9)
}
 0x118   :  { %397 = dma.vmem_to_hbm [thread:$0]  %s392_s18, 512, %s680_s3, [#allocation4], %s581_s22, %s581_s22, %s582_s23  }
 0x119   :  { %578 = dma.done.wait [#allocation4], 512  }
 0x11a   :  { %579 = vsyncadd [#allocation4], 4294966784 }
 0x11b   :  { %401 = vsyncpa [#allocation3], 1 }
 0x11c   :  { %402 = vsyncpa [#allocation6], 1 }
 0x11d   :  { %403 = vsyncpa [#allocation4], 1 }

</bundles_post_ra>
